<compile_context>
chip_gen: v7x
topology: tpu7x:2x2x1
jax: 0.10.0
libtpu: 0.0.40
codegen_flags: <defaults>
</compile_context>

<pallas_src>
import functools
import math

import jax
import jax.numpy as jnp
from jax.experimental import pallas as pl
from jax.experimental.pallas import tpu as pltpu

_EPS = 1e-5  # PyTorch LayerNorm default eps

# Contract the last dim of both operands: x @ W.T without any transpose.
_CONTRACT_LAST = (((1,), (1,)), ((), ()))


def _layer_norm(x):
    # elementwise_affine=False LayerNorm over the last dim (biased variance).
    mean = jnp.mean(x, axis=-1, keepdims=True)
    var = jnp.mean((x - mean) ** 2, axis=-1, keepdims=True)
    return (x - mean) * jax.lax.rsqrt(var + _EPS)


def gcn_learner_kernel(q_ref, k_ref, w1_ref, w2g_ref,
                       node_out_ref, adj_out_ref, *, n, adj_flat):
    # q_ref / k_ref / node_out_ref : (bb*N, D) row slabs (bb batches per step)
    # adj_out_ref                  : (bb, N, N), or lane-dense (bb, 1, N*N)
    # w1_ref = W1 * (1/sqrt(D)) (scale pre-folded); w2g_ref = concat([W2, Wg]).
    bb = adj_out_ref.shape[0]
    q = q_ref[...]                       # compute dtype (bf16 by default)
    k = k_ref[...]
    d = q.shape[-1]
    cd = q.dtype

    # --- AdjLearner FCNet on the query path (one GEMM, no transposes) ---
    node_a = jnp.maximum(
        jax.lax.dot_general(q, w1_ref[...], _CONTRACT_LAST,
                            preferred_element_type=jnp.float32), 0.0)

    # --- Key path: W2/Wg fused -> one (bb*N, 2D) GEMM; slice node_b / support ---
    kb = jax.lax.dot_general(k, w2g_ref[...], _CONTRACT_LAST,
                             preferred_element_type=jnp.float32)   # (bb*N, 2D)
    node_b = jnp.maximum(kb[:, :d], 0.0)
    support = kb[:, d:]

    # --- per-batch attention scores (batched einsum, contraction on last dims) ---
    na = node_a.astype(cd).reshape(bb, n, d)
    nb = node_b.astype(cd).reshape(bb, n, d)
    scores = jnp.einsum("bnd,bmd->bnm", na, nb,
                        preferred_element_type=jnp.float32)        # (bb, N, N)

    # --- softmax over the neighbour axis.  At most two (bb, N, N) f32 temps are
    # live at once (scores dies into e, e dies into adj).  Exact reciprocal so
    # adj rows sum to 1 (review correctness concern about approx=True). ---
    m = jnp.max(scores, axis=-1, keepdims=True)
    e = jnp.exp(scores - m)
    denom = jnp.sum(e, axis=-1, keepdims=True)
    adj = e * pl.reciprocal(denom, approx=False)

    # --- GraphConvolution (num_head=1): out = LayerNorm(adj @ (k @ Wg.T)) ---
    sup = support.astype(cd).reshape(bb, n, d)
    out = jnp.einsum("bnm,bmd->bnd", adj.astype(cd), sup,
                     preferred_element_type=jnp.float32)           # (bb, N, D)
    out = _layer_norm(out.reshape(bb * n, d))

    # --- GCN wrapper: ReLU, dropout (identity in eval), residual + LayerNorm ---
    node = _layer_norm(q.astype(jnp.float32) + jnp.maximum(out, 0.0))

    node_out_ref[...] = node.astype(node_out_ref.dtype)
    if adj_flat:
        adj_out_ref[...] = adj.reshape(bb, 1, n * n).astype(adj_out_ref.dtype)
    else:
        adj_out_ref[...] = adj.astype(adj_out_ref.dtype)
    # TODO(synk): num_head > 1, node_mask / graph_mask fills, training-mode
    # dropout and the fixed=True predefined-graph path are not exercised here.


def _vmem_budget_bytes():
    """Generation-aware VMEM limit: ~100 MiB on 128 MiB parts (v5e/v6e),
    ~48 MiB on 64 MiB parts (v7x); conservative fallback if the query fails."""
    phys = 64 * 1024 * 1024
    try:
        phys = int(pltpu.get_tpu_info().vmem_capacity_bytes)
    except Exception:
        pass
    if phys >= 128 * 1024 * 1024:
        return 100 * 1024 * 1024
    return min(48 * 1024 * 1024, int(phys * 0.75))


def _pick_batch_block(B, N, per_batch_bytes, budget_bytes, max_rows):
    """Largest divisor bb of B giving >=2 grid steps (pipelining + v7x megacore),
    an (8,128)-legal (bb*N, D) block, and a VMEM-fitting step."""
    divisors = [d for d in range(1, B + 1) if B % d == 0]

    def legal(bb):
        # second-last block dim of the (B*N, D) slabs must be %8 or full extent
        return (bb * N) % 8 == 0 or bb == B

    for cap_rows in (max_rows, None):            # relax the row cap if needed
        cands = [bb for bb in divisors
                 if bb < B and legal(bb)
                 and bb * per_batch_bytes <= budget_bytes
                 and (cap_rows is None or bb * N <= cap_rows)]
        if cands:
            return max(cands)
    return B                                      # single full-extent block


def gcn_learner(query, key, w1, w2, wg, *,
                compute_dtype=jnp.bfloat16, max_rows_per_step=2048):
    """query/key: (B, N, D) f32; w1/w2/wg: (D, D) PyTorch-style (out, in).

    Returns (node_feature (B, N, D) f32, graph_adj (B, 1, N, N) f32).
    compute_dtype controls the matmul-operand dtype only; accumulation,
    softmax, LayerNorm and outputs stay f32.
    """
    B, N, D = query.shape
    cd = jnp.dtype(compute_dtype)

    # One-time weight/input preprocessing (outside the per-step kernel body):
    #  * fold the 1/sqrt(d_k) attention scale into W1 (ReLU commutes with it),
    #  * fuse W2 and Wg into a single (2D, D) weight for one wide GEMM,
    #  * cast matmul operands to the compute dtype (bf16: 2x MXU, half HBM
    #    traffic on q/k), row-major (B,N,D)->(B*N,D) is a free bitcast.
    w1s = (w1 * (1.0 / math.sqrt(D))).astype(cd)
    w2g = jnp.concatenate([w2, wg], axis=0).astype(cd)             # (2D, D)
    q2 = query.reshape(B * N, D).astype(cd)
    k2 = key.reshape(B * N, D).astype(cd)

    # Batch tiling: multi-step grid so BlockSpec double-buffering overlaps the
    # q/k loads and node/adj writebacks with compute, and both v7x TensorCores
    # get work via the "parallel" axis.
    vmem_limit = _vmem_budget_bytes()
    cdb = cd.itemsize
    per_batch = (N * D * (7 * cdb + 40)      # q/k (2-buf) + node out + f32 temps
                 + N * N * (cdb + 20))       # adj out (2-buf) + softmax temps
    weight_bytes = 2 * 3 * D * D * cdb
    block_budget = max(int(vmem_limit * 0.75) - weight_bytes, per_batch)
    bb = _pick_batch_block(B, N, per_batch, block_budget, max_rows_per_step)
    num_blocks = B // bb

    # Lane-dense adj layout: if N is not a lane multiple but N*N is, store adj
    # as a (bb, 1, N*N) slab (unmasked vst) and reshape back in the wrapper.
    adj_flat = (N % 128 != 0) and ((N * N) % 128 == 0)
    if adj_flat:
        adj_shape = (B, 1, N * N)
        adj_spec = pl.BlockSpec((bb, 1, N * N), lambda i: (i, 0, 0))
    else:
        adj_shape = (B, N, N)
        adj_spec = pl.BlockSpec((bb, N, N), lambda i: (i, 0, 0))
    # TODO(synk): if profiling shows the adj writeback DMA is still exposed,
    # bump this out_spec to pipeline_mode=pl.Buffered(3) or grow bb.

    kernel = functools.partial(gcn_learner_kernel, n=N, adj_flat=adj_flat)

    node_flat, adj_raw = pl.pallas_call(
        kernel,
        out_shape=(
            jax.ShapeDtypeStruct((B * N, D), jnp.float32),
            jax.ShapeDtypeStruct(adj_shape, jnp.float32),
        ),
        grid_spec=pltpu.PrefetchScalarGridSpec(
            num_scalar_prefetch=0,
            grid=(num_blocks,),
            in_specs=[
                pl.BlockSpec((bb * N, D), lambda i: (i, 0)),
                pl.BlockSpec((bb * N, D), lambda i: (i, 0)),
                pl.BlockSpec((D, D), lambda i: (0, 0)),        # constant block: no re-DMA
                pl.BlockSpec((2 * D, D), lambda i: (0, 0)),    # constant block: no re-DMA
            ],
            out_specs=[
                pl.BlockSpec((bb * N, D), lambda i: (i, 0)),
                adj_spec,
            ],
        ),
        compiler_params=pltpu.CompilerParams(
            dimension_semantics=("parallel",),
            vmem_limit_bytes=vmem_limit,
        ),
    )(q2, k2, w1s, w2g)

    node = node_flat.reshape(B, N, D)
    if adj_flat:
        adj = adj_raw.reshape(B, 1, N, N)
    else:
        adj = adj_raw[:, None, :, :]
    return node, adj


def _reference(query, key, w1, w2, wg, compute_dtype=jnp.float32):
    """Pure-JAX reference mirroring the kernel's operand-cast / scale-folding
    pattern (identical to the PyTorch module math up to rounding when
    compute_dtype == float32)."""
    cd = jnp.dtype(compute_dtype)
    d = query.shape[-1]
    q = query.astype(cd)
    k = key.astype(cd)
    w1s = (w1 * (1.0 / math.sqrt(d))).astype(cd)
    node_a = jnp.maximum(
        jnp.einsum("bnd,od->bno", q, w1s,
                   preferred_element_type=jnp.float32), 0.0)
    node_b = jnp.maximum(
        jnp.einsum("bnd,od->bno", k, w2.astype(cd),
                   preferred_element_type=jnp.float32), 0.0)
    support = jnp.einsum("bnd,od->bno", k, wg.astype(cd),
                         preferred_element_type=jnp.float32)
    scores = jnp.einsum("bnd,bmd->bnm", node_a.astype(cd), node_b.astype(cd),
                        preferred_element_type=jnp.float32)
    adj = jax.nn.softmax(scores, axis=-1)
    out = jnp.einsum("bnm,bmd->bnd", adj.astype(cd), support.astype(cd),
                     preferred_element_type=jnp.float32)
    out = _layer_norm(out)
    node = _layer_norm(q.astype(jnp.float32) + jnp.maximum(out, 0.0))
    return node, adj[:, None, :, :]


if __name__ == "__main__":
    B, N, D = 2, 8, 32   # small shapes consistent with (B, N, module_dim)

    root = jax.random.PRNGKey(0)
    kq, kk, k1, k2, kg = jax.random.split(root, 5)
    query = jax.random.normal(kq, (B, N, D), dtype=jnp.float32)
    key = jax.random.normal(kk, (B, N, D), dtype=jnp.float32)
    # Deterministic synthetic weights (weight_norm at init == raw weight).
    w1 = jax.random.normal(k1, (D, D), dtype=jnp.float32) * 0.1
    w2 = jax.random.normal(k2, (D, D), dtype=jnp.float32) * 0.1
    wg = jax.random.normal(kg, (D, D), dtype=jnp.float32) * 0.1

    # Exact path: f32 matmul operands, exact softmax reciprocal.
    node_f32, adj_f32 = gcn_learner(query, key, w1, w2, wg,
                                    compute_dtype=jnp.float32)
    jax.block_until_ready((node_f32, adj_f32))
    assert node_f32.shape == (B, N, D)
    assert adj_f32.shape == (B, 1, N, N)
    ref_node, ref_adj = _reference(query, key, w1, w2, wg,
                                   compute_dtype=jnp.float32)
    assert jnp.allclose(node_f32, ref_node, atol=1e-2, rtol=1e-2)
    assert jnp.allclose(adj_f32, ref_adj, atol=1e-2, rtol=1e-2)

    # Default fast path: bf16 matmul operands, f32 accumulation and outputs.
    node_bf, adj_bf = gcn_learner(query, key, w1, w2, wg)
    jax.block_until_ready((node_bf, adj_bf))
    ref_node_bf, ref_adj_bf = _reference(query, key, w1, w2, wg,
                                         compute_dtype=jnp.bfloat16)
    assert node_bf.shape == (B, N, D)
    assert adj_bf.shape == (B, 1, N, N)
    assert jnp.allclose(node_bf, ref_node_bf, atol=2e-2, rtol=2e-2)
    assert jnp.allclose(adj_bf, ref_adj_bf, atol=2e-2, rtol=2e-2)

    print("KERNEL_OK")
</pallas_src>

<mosaic_0001>
module attributes {stable_mosaic.version = 11 : i64} {
  func.func @gcn_learner_kernel(%arg0: i32, %arg1: memref<8x32xf32, #tpu.memory_space<vmem>>, %arg2: memref<8x32xf32, #tpu.memory_space<vmem>>, %arg3: memref<32x32xf32, #tpu.memory_space<vmem>>, %arg4: memref<64x32xf32, #tpu.memory_space<vmem>>, %arg5: memref<8x32xf32, #tpu.memory_space<vmem>>, %arg6: memref<1x8x8xf32, #tpu.memory_space<vmem>>) attributes {dimension_semantics = [#tpu.dimension_semantics<parallel>], iteration_bounds = array<i64: 2>, scalar_prefetch = 0 : i64, scratch_operands = 0 : i64, tpu.core_type = #tpu.core_type<tc>, window_params = [{transform_indices = @transform_0, window_bounds = array<i64: 8, 32>}, {transform_indices = @transform_1, window_bounds = array<i64: 8, 32>}, {pipeline_mode = #tpu.pipeline_mode<synchronous>, transform_indices = @transform_2, window_bounds = array<i64: 32, 32>}, {pipeline_mode = #tpu.pipeline_mode<synchronous>, transform_indices = @transform_3, window_bounds = array<i64: 64, 32>}, {transform_indices = @transform_4, window_bounds = array<i64: 8, 32>}, {transform_indices = @transform_5, window_bounds = array<i64: 1, 8, 8>}]} {
    %c0 = arith.constant 0 : index
    %c0_0 = arith.constant 0 : index
    %0 = vector.load %arg1[%c0, %c0_0] : memref<8x32xf32, #tpu.memory_space<vmem>>, vector<8x32xf32>
    %c0_1 = arith.constant 0 : index
    %c0_2 = arith.constant 0 : index
    %1 = vector.load %arg2[%c0_1, %c0_2] : memref<8x32xf32, #tpu.memory_space<vmem>>, vector<8x32xf32>
    %c0_3 = arith.constant 0 : index
    %c0_4 = arith.constant 0 : index
    %2 = vector.load %arg3[%c0_3, %c0_4] : memref<32x32xf32, #tpu.memory_space<vmem>>, vector<32x32xf32>
    %cst = arith.constant dense<0.000000e+00> : vector<8x32xf32>
    %3 = tpu.matmul %0, %2, %cst {dimension_numbers = #tpu.dot_dimension_numbers<[1], [1], [0], [0], [0, 0, 1, 0], [], []>} : vector<8x32xf32>, vector<32x32xf32>, vector<8x32xf32> -> vector<8x32xf32>
    %cst_5 = arith.constant 0.000000e+00 : f32
    %4 = vector.broadcast %cst_5 : f32 to vector<8x32xf32>
    %5 = arith.maximumf %3, %4 : vector<8x32xf32>
    %c0_6 = arith.constant 0 : index
    %c0_7 = arith.constant 0 : index
    %6 = vector.load %arg4[%c0_6, %c0_7] : memref<64x32xf32, #tpu.memory_space<vmem>>, vector<64x32xf32>
    %cst_8 = arith.constant dense<0.000000e+00> : vector<8x64xf32>
    %7 = tpu.matmul %1, %6, %cst_8 {dimension_numbers = #tpu.dot_dimension_numbers<[1], [1], [0], [0], [0, 0, 1, 0], [], []>} : vector<8x32xf32>, vector<64x32xf32>, vector<8x64xf32> -> vector<8x64xf32>
    %8 = vector.extract_strided_slice %7 {offsets = [0, 0], sizes = [8, 32], strides = [1, 1]} : vector<8x64xf32> to vector<8x32xf32>
    %cst_9 = arith.constant 0.000000e+00 : f32
    %9 = vector.broadcast %cst_9 : f32 to vector<8x32xf32>
    %10 = arith.maximumf %8, %9 : vector<8x32xf32>
    %11 = vector.extract_strided_slice %7 {offsets = [0, 32], sizes = [8, 32], strides = [1, 1]} : vector<8x64xf32> to vector<8x32xf32>
    %12 = vector.shape_cast %5 : vector<8x32xf32> to vector<1x8x32xf32>
    %13 = vector.shape_cast %10 : vector<8x32xf32> to vector<1x8x32xf32>
    "tpu.trace_start"() <{level = 10 : i32, message = "bnd,bmd->bnm"}> : () -> ()
    %cst_10 = arith.constant dense<0.000000e+00> : vector<1x8x8xf32>
    %14 = tpu.matmul %12, %13, %cst_10 {dimension_numbers = #tpu.dot_dimension_numbers<[2], [2], [1], [1], [0, 0, 0, 1, 1, 1], [0], [0]>} : vector<1x8x32xf32>, vector<1x8x32xf32>, vector<1x8x8xf32> -> vector<1x8x8xf32>
    "tpu.trace_stop"() : () -> ()
    %cst_11 = arith.constant dense<0xFF800000> : vector<1x8xf32>
    %15 = vector.multi_reduction <maximumf>, %14, %cst_11 [2] : vector<1x8x8xf32> to vector<1x8xf32>
    %16 = vector.shape_cast %15 : vector<1x8xf32> to vector<1x8x1xf32>
    %17 = vector.broadcast %16 : vector<1x8x1xf32> to vector<1x8x8xf32>
    %18 = arith.subf %14, %17 : vector<1x8x8xf32>
    %19 = math.exp %18 : vector<1x8x8xf32>
    %cst_12 = arith.constant dense<0.000000e+00> : vector<1x8xf32>
    %20 = vector.multi_reduction <add>, %19, %cst_12 [2] : vector<1x8x8xf32> to vector<1x8xf32>
    %21 = vector.shape_cast %20 : vector<1x8xf32> to vector<1x8x1xf32>
    %22 = tpu.reciprocal %21 : vector<1x8x1xf32> -> vector<1x8x1xf32>
    %23 = vector.broadcast %22 : vector<1x8x1xf32> to vector<1x8x8xf32>
    %24 = arith.mulf %19, %23 : vector<1x8x8xf32>
    %25 = vector.shape_cast %11 : vector<8x32xf32> to vector<1x8x32xf32>
    "tpu.trace_start"() <{level = 10 : i32, message = "bnm,bmd->bnd"}> : () -> ()
    %cst_13 = arith.constant dense<0.000000e+00> : vector<1x8x32xf32>
    %26 = tpu.matmul %24, %25, %cst_13 {dimension_numbers = #tpu.dot_dimension_numbers<[2], [1], [1], [2], [0, 0, 0, 1, 1, 2], [0], [0]>} : vector<1x8x8xf32>, vector<1x8x32xf32>, vector<1x8x32xf32> -> vector<1x8x32xf32>
    "tpu.trace_stop"() : () -> ()
    %27 = vector.shape_cast %26 : vector<1x8x32xf32> to vector<8x32xf32>
    %cst_14 = arith.constant dense<0.000000e+00> : vector<8xf32>
    %28 = vector.multi_reduction <add>, %27, %cst_14 [1] : vector<8x32xf32> to vector<8xf32>
    %29 = vector.shape_cast %28 : vector<8xf32> to vector<8x1xf32>
    %cst_15 = arith.constant 3.200000e+01 : f32
    %30 = vector.broadcast %cst_15 : f32 to vector<8x1xf32>
    %31 = arith.divf %29, %30 : vector<8x1xf32>
    %32 = vector.broadcast %31 : vector<8x1xf32> to vector<8x32xf32>
    %33 = arith.subf %27, %32 : vector<8x32xf32>
    %34 = arith.mulf %33, %33 : vector<8x32xf32>
    %cst_16 = arith.constant dense<0.000000e+00> : vector<8xf32>
    %35 = vector.multi_reduction <add>, %34, %cst_16 [1] : vector<8x32xf32> to vector<8xf32>
    %36 = vector.shape_cast %35 : vector<8xf32> to vector<8x1xf32>
    %cst_17 = arith.constant 3.200000e+01 : f32
    %37 = vector.broadcast %cst_17 : f32 to vector<8x1xf32>
    %38 = arith.divf %36, %37 : vector<8x1xf32>
    %39 = vector.broadcast %31 : vector<8x1xf32> to vector<8x32xf32>
    %40 = arith.subf %27, %39 : vector<8x32xf32>
    %cst_18 = arith.constant 9.99999974E-6 : f32
    %41 = vector.broadcast %cst_18 : f32 to vector<8x1xf32>
    %42 = arith.addf %38, %41 : vector<8x1xf32>
    %43 = math.rsqrt %42 : vector<8x1xf32>
    %44 = vector.broadcast %43 : vector<8x1xf32> to vector<8x32xf32>
    %45 = arith.mulf %40, %44 : vector<8x32xf32>
    %cst_19 = arith.constant 0.000000e+00 : f32
    %46 = vector.broadcast %cst_19 : f32 to vector<8x32xf32>
    %47 = arith.maximumf %45, %46 : vector<8x32xf32>
    %48 = arith.addf %0, %47 : vector<8x32xf32>
    %cst_20 = arith.constant dense<0.000000e+00> : vector<8xf32>
    %49 = vector.multi_reduction <add>, %48, %cst_20 [1] : vector<8x32xf32> to vector<8xf32>
    %50 = vector.shape_cast %49 : vector<8xf32> to vector<8x1xf32>
    %cst_21 = arith.constant 3.200000e+01 : f32
    %51 = vector.broadcast %cst_21 : f32 to vector<8x1xf32>
    %52 = arith.divf %50, %51 : vector<8x1xf32>
    %53 = vector.broadcast %52 : vector<8x1xf32> to vector<8x32xf32>
    %54 = arith.subf %48, %53 : vector<8x32xf32>
    %55 = arith.mulf %54, %54 : vector<8x32xf32>
    %cst_22 = arith.constant dense<0.000000e+00> : vector<8xf32>
    %56 = vector.multi_reduction <add>, %55, %cst_22 [1] : vector<8x32xf32> to vector<8xf32>
    %57 = vector.shape_cast %56 : vector<8xf32> to vector<8x1xf32>
    %cst_23 = arith.constant 3.200000e+01 : f32
    %58 = vector.broadcast %cst_23 : f32 to vector<8x1xf32>
    %59 = arith.divf %57, %58 : vector<8x1xf32>
    %60 = vector.broadcast %52 : vector<8x1xf32> to vector<8x32xf32>
    %61 = arith.subf %48, %60 : vector<8x32xf32>
    %cst_24 = arith.constant 9.99999974E-6 : f32
    %62 = vector.broadcast %cst_24 : f32 to vector<8x1xf32>
    %63 = arith.addf %59, %62 : vector<8x1xf32>
    %64 = math.rsqrt %63 : vector<8x1xf32>
    %65 = vector.broadcast %64 : vector<8x1xf32> to vector<8x32xf32>
    %66 = arith.mulf %61, %65 : vector<8x32xf32>
    %c0_25 = arith.constant 0 : index
    %c0_26 = arith.constant 0 : index
    %67 = vector.load %arg5[%c0_25, %c0_26] : memref<8x32xf32, #tpu.memory_space<vmem>>, vector<8x32xf32>
    tpu.vector_store %arg5[%c0_25, %c0_26], %66 {strides = array<i32>} : memref<8x32xf32, #tpu.memory_space<vmem>>, vector<8x32xf32>,
    %c0_27 = arith.constant 0 : index
    %c0_28 = arith.constant 0 : index
    %c0_29 = arith.constant 0 : index
    %68 = vector.load %arg6[%c0_27, %c0_28, %c0_29] : memref<1x8x8xf32, #tpu.memory_space<vmem>>, vector<1x8x8xf32>
    tpu.vector_store %arg6[%c0_27, %c0_28, %c0_29], %24 {strides = array<i32>} : memref<1x8x8xf32, #tpu.memory_space<vmem>>, vector<1x8x8xf32>,
    return
  }
  func.func @transform_0(%arg0: i32) -> (i32, i32) {
    %c0_i32 = arith.constant 0 : i32
    %c0_i32_0 = arith.constant 0 : i32
    return %arg0, %c0_i32 : i32, i32
  }
  func.func @transform_1(%arg0: i32) -> (i32, i32) {
    %c0_i32 = arith.constant 0 : i32
    %c0_i32_0 = arith.constant 0 : i32
    return %arg0, %c0_i32 : i32, i32
  }
  func.func @transform_2(%arg0: i32) -> (i32, i32) {
    %c0_i32 = arith.constant 0 : i32
    %c0_i32_0 = arith.constant 0 : i32
    %c0_i32_1 = arith.constant 0 : i32
    return %c0_i32, %c0_i32_0 : i32, i32
  }
  func.func @transform_3(%arg0: i32) -> (i32, i32) {
    %c0_i32 = arith.constant 0 : i32
    %c0_i32_0 = arith.constant 0 : i32
    %c0_i32_1 = arith.constant 0 : i32
    return %c0_i32, %c0_i32_0 : i32, i32
  }
  func.func @transform_4(%arg0: i32) -> (i32, i32) {
    %c0_i32 = arith.constant 0 : i32
    %c0_i32_0 = arith.constant 0 : i32
    return %arg0, %c0_i32 : i32, i32
  }
  func.func @transform_5(%arg0: i32) -> (i32, i32, i32) {
    %c0_i32 = arith.constant 0 : i32
    %c0_i32_0 = arith.constant 0 : i32
    %c0_i32_1 = arith.constant 0 : i32
    return %arg0, %c0_i32, %c0_i32_0 : i32, i32, i32
  }
}

</mosaic_0001>

<bundles_post_ra>
// kernel: tpu_custom_call.1
= control target key start
LH: loop header
LB: loop body
LE: loop exit
PB: predicated region body
PF: predicated region fallthrough
CT: control target
= control target key end

     0   :  { %11 = vsyncpa [#allocation3], 0  ;;  %s1296_s0 = inlined_call_operand.vmem [shape: f32[16,32], index: 0, kind: input, shape index: {}]   ;;  %s1297_s1 = inlined_call_operand.vmem [shape: f32[16,32], index: 1, kind: input, shape index: {}]   ;;  %s1298_s2 = inlined_call_operand.vmem [shape: f32[32,32], index: 2, kind: input, shape index: {}]   ;;  %s1299_s3 = inlined_call_operand.vmem [shape: f32[64,32], index: 3, kind: input, shape index: {}]   ;;  %s1300_s4 = inlined_call_operand.hbm [shape: f32[16,32], index: 4, kind: output, shape index: {0}]   ;;  %s1301_s5 = inlined_call_operand.hbm [shape: f32[2,8,8], index: 5, kind: output, shape index: {1}]  }
   0x1   :  { %13 = vsyncpa [#allocation3 + $0x1], 0 }
   0x2   :  { %14 = vsyncpa [#allocation5], 0 }
   0x3   :  { %16 = vsyncpa [#allocation5 + $0x1], 0  ;;  %s1079_s18 = smov 0   ;;  %s1081_s19 = smov 0  }
   0x4   :  { %s1083_s20 = smov 0   ;;  %s1085_s21 = smov 0  }
   0x5 LB: > { %s1100_s22 = sadd.s32 4294967295, %s1041_s21   ;;  %s778_s23 = sadd.s32 4294967294, %s1041_s21   ;;  %s1041_s21 = sphi %s1085_s21, %s1309_s21   ;;  %s1037_s20 = sphi %s1083_s20, %s1308_s20   ;;  %s1033_s19 = sphi %s1081_s19, %s1307_s19   ;;  %s1029_s18 = sphi %s1079_s18, %s1306_s18  }
   0x6   : > { %s1104_s24 = sadd.s32 1, %s1041_s21   ;;  %s123_s25 = sadd.s32 1, %s1037_s20 }
   0x7   : > { %s120_s26 = ssub.s32 %s1041_s21, %s1104_s24  ;;  %p133_p0 = scmp.ne.s32.totalorder %s1037_s20, %s1033_s19 }
   0x8   : > { %p121_p1 = scmp.eq.s32.totalorder %s120_s26, 0  ;;  %p134_p2 = scmp.eq.s32.totalorder %s1100_s22, 1 }
   0x9   : > { %p139_p3 = scmp.ne.s32.totalorder %s1033_s19, %s1029_s18  ;;  %p140_p4 = scmp.eq.s32.totalorder %s778_s23, 1 }
   0xa   : > { %s1115_s27 = scalar_select %p121_p1, %s1037_s20, %s123_s25  }
   0xb   : > { %p1117_p5 = por %p134_p2, %p133_p0  ;;  %p1121_p6 = por %p140_p4, %p139_p3 }
   0xc   : > { %p781_p7 = scmp.ge.s32.totalorder %s1041_s21, 1  ;;  %p204_p8 = scmp.lt.s32.totalorder %s1041_s21, 3 }
   0xe   : > { %p205_p9 = pnand %p781_p7, %p204_p8 }
   0xf   : > { %vm254_vm0 = vcmask (!%p205_p9), 261120   ;;  %v341_v0 = vld [vmem:[%s1299_s3] sm:$0xff] (!%p205_p9)  ;;  %v342_v1 = vld [vmem:[%s1299_s3 + $0x8] sm:$0xff] (!%p205_p9)  ;;  %v1043_v2 = vmov (!%p205_p9), 0.0|0.0   ;;  %vm1044_vm2 = vmmov (!%p205_p9), 0   ;;  %v1045_v7 = vmov (!%p205_p9), 0.0  }
  0x10   : > { %208 = sbr.rel (%p205_p9) target bundleno = 1640 (0x668), region = 36  ;;  %875 = vmatprep.subr.bf16.mxu1 (!%p205_p9), %v1043_v2  ;;  %vm1135_vm1 = vmpackc.low (!%p205_p9), %vm254_vm0, %vm254_vm0  ;;  %v876_v4 = vpack.c.bf16 (!%p205_p9), %v342_v1, %v341_v0  ;;  %867 = vmatprep.subr.bf16.mxu0 (!%p205_p9), %v1043_v2  ;;  %v250_v5 = vld [vmem:[%s1298_s2] sm:$0xff] (!%p205_p9)  ;;  %v251_v6 = vld [vmem:[%s1298_s2 + $0x8] sm:$0xff] (!%p205_p9)  ;;  %p240_p10 = scmp.lt.s32.totalorder (!%p205_p9), %s1100_s22, 1  ;;  %vm523_vm3 = vcmask (!%p205_p9), 64512  }
  0x11   : > { %854 = vmatprep.mubr.msk.f32.mxu1 (!%p205_p9), %vm1044_vm2, %v1045_v7  ;;  %835 = vmatprep.mubr.msk.f32.mxu0 (!%p205_p9), %vm1044_vm2, %v1045_v7  ;;  %v868_v8 = vpack.c.bf16 (!%p205_p9), %v251_v6, %v250_v5  ;;  %v343_v9 = vld [vmem:[%s1299_s3 + $0x10] sm:$0xff] (!%p205_p9)  ;;  %v344_v10 = vld [vmem:[%s1299_s3 + $0x18] sm:$0xff] (!%p205_p9)  ;;  %v345_v15 = vld [vmem:[%s1299_s3 + $0x20] sm:$0xff] (!%p205_p9)  ;;  %s1203_s6 = sand.u32 (!%p205_p9), 1, %s1033_s19   ;;  %s805_s9 = sshll.u32 (!%p205_p9), %s1100_s22, 7 }
  0x12   : > { %878 = vmatpush3.bf16.xpose.msk.msra.mxu1 (!%p205_p9), %vm1135_vm1, %v876_v4  ;;  %v252_v11 = vld [vmem:[%s1298_s2 + $0x10] sm:$0xff] (!%p205_p9)  ;;  %v253_v12 = vld [vmem:[%s1298_s2 + $0x18] sm:$0xff] (!%p205_p9)  ;;  %v880_v13 = vpack.c.bf16 (!%p205_p9), %v344_v10, %v343_v9  ;;  %v346_v16 = vld [vmem:[%s1299_s3 + $0x28] sm:$0xff] (!%p205_p9)  ;;  %s782_s7 = sshll.u32 (!%p205_p9), %s1203_s6, 3  ;;  %s1224_s12 = scalar_lea.hbm (!%p205_p9), %s1301_s5, %s805_s9 }
  0x13   : > { %879 = vmatprep.subr.bf16.mxu1 (!%p205_p9), %v1043_v2  ;;  %870 = vmatpush3.bf16.xpose.msk.msra.mxu0 (!%p205_p9), %vm1135_vm1, %v868_v8  ;;  %v872_v14 = vpack.c.bf16 (!%p205_p9), %v253_v12, %v252_v11  ;;  %v884_v17 = vpack.c.bf16 (!%p205_p9), %v346_v16, %v345_v15  ;;  %v347_v19 = vld [vmem:[%s1299_s3 + $0x30] sm:$0xff] (!%p205_p9)  ;;  %v348_v20 = vld [vmem:[%s1299_s3 + $0x38] sm:$0xff] (!%p205_p9)  ;;  %s1209_s8 = scalar_lea.vmem (!%p205_p9), [#allocation4], %s782_s7  ;;  %s649_s14 = scalar_lea.sflag (!%p205_p9), [#allocation5], %s1203_s6 }
  0x14   : > { %871 = vmatprep.subr.bf16.mxu0 (!%p205_p9), %v1043_v2  ;;  %v888_v21 = vpack.c.bf16 (!%p205_p9), %v348_v20, %v347_v19  ;;  %s1047_s16 = smov (!%p205_p9), [#allocation4]  }
  0x15   : > { %s951_s17 = sshll.u32 (!%p205_p9), %s1047_s16, 4  ;;  %s952_s17 = int_to_ptr.vmem [resolvable:$false] %s951_s17 }
  0x16   : > { %s953_s23 = scalar_lea.vmem (!%p205_p9), %s952_s17, 256 }
  0x17   : > { %s241_s30 = scalar_select %p240_p10, %s1100_s22, 1 }
  0x19   : > { %s784_s10 = sshll.u32 %s241_s30, 3  ;;  %s1046_s30 = smov 96  }
  0x1a   : > { %882 = vmatpush3.bf16.xpose.msk.msra.mxu1 %vm1135_vm1, %v880_v13  ;;  %s243_s13 = scalar_lea.vmem %s1296_s0, %s784_s10  ;;  %s247_s26 = scalar_lea.vmem %s1297_s1, %s784_s10 }
  0x1b   : > { %883 = vmatprep.subr.bf16.mxu1 %v1043_v2  ;;  %874 = vmatpush3.bf16.xpose.msk.msra.mxu0 %vm1135_vm1, %v872_v14  ;;  %v1178_v18 = vld [vmem:[%s243_s13] sm:$0xff]  ;;  %s675_s13 = sshll.u32 %s1209_s8, 4  ;;  %s676_s13 = int_to_ptr.vmem [resolvable:$true] %s675_s13 }
  0x1c   : > { %857 = vmatprep.subr.mxu0 %v1045_v7  ;;  %v249_v22 = vld [vmem:[%s247_s26] sm:$0xff]  ;;  %s947_s15 = scalar_lea.vmem %s676_s13, 128  ;;  %p954_p0 = scmp.lt.s32.totalorder %s676_s13, %s952_s17 }
  0x1d   : > { %p948_p11 = scmp.ne.s32.totalorder %s676_s13, %s947_s15  ;;  %p955_p1 = scmp.lt.s32.totalorder %s953_s23, %s947_s15 }
  0x1f   : > { %p949_p12 = pnand %p948_p11, %p1117_p5  ;;  %p956_p2 = por %p955_p1, %p954_p0 }
  0x21   : > { %p950_p13 = pneg %p949_p12 }
  0x22   : > { %886 = vmatpush3.bf16.xpose.msk.msra.mxu1 %vm1135_vm1, %v884_v17  ;;  %836 = vmatmul.mubr.msk.f32.vlgmr.msra.gmra.mrb[0].mxu0 %vm254_vm0, %v1178_v18 }
  0x23   : > { %887 = vmatprep.subr.bf16.mxu1 %v1043_v2  ;;  %859 = vmatprep.mubr.msk.f32.mxu0 %vm1044_vm2, %v1045_v7  ;;  %p957_p3 = pnand %p956_p2, %p950_p13 }
  0x2a   : > { %890 = vmatpush3.bf16.xpose.msk.msra.mxu1 %vm1135_vm1, %v888_v21 }
  0x31   : > { %855 = vmatmul.mubr.msk.f32.vlgmr.msra.gmra.mrb[0].mxu1 %vm254_vm0, %v249_v22 }
  0xf5   : > { %v336_v23 = vpop.f32.mrb[0].mxu0 }
  0xf6   : > { %v837_v24 = vpop.f32.mrb[1].mxu0  ;;  %v340_v28 = vmax.f32 %v336_v23, 0.0 }
 0x104   : > { %v442_v25 = vpop.f32.mrb[0].mxu1 }
 0x105   : > { %v446_v26 = vmax.f32 %v442_v25, 0.0  ;;  %536 = vrot.lane.b32.xlu1 %v442_v25, %s1046_s30  ;;  %v856_v27 = vpop.f32.mrb[1].mxu1 }
 0x107   : > { %858 = vmatpush3.xpose.msk.msra.mxu0 %vm254_vm0, %v446_v26 }
 0x108   : > { %862 = vmatprep.subr.mxu0 %v1045_v7 }
 0x10a   : > { %860 = vmatmul.mubr.msk.f32.vlgmr.msra.gmra.mrb[2].mxu0 %vm254_vm0, %v340_v28 }
 0x10b   : > { %864 = vmatprep.mubr.msk.f32.mxu0 %vm1044_vm2, %v1045_v7 }
 0x177   : > { %v537_v29 = vpop.permute.xlu1 %536 }
 0x178   : > { %863 = vmatpush3.msra.mxu0 %v537_v29 }
 0x1dd   : > { %v519_v30 = vpop.f32.mrb[2].mxu0 }
 0x1de   : > { %v861_v31 = vpop.f32.mrb[3].mxu0  ;;  %v524_v32 = vsel %vm523_vm3, %v519_v30, -inf }
 0x1df   : > { %525 = vmax.xlane.f32.xlu0 %v524_v32 }
 0x26c   : > { %v526_v33 = vpop.xlane.xlu0 %525 }
 0x26d   : > { %v527_v34 = vsub.f32 %v519_v30, %v526_v33 }
 0x26f   : > { %v528_v35 = vmul.f32 1.442695, %v527_v34 }
 0x271   : > { %939 = vpow2.f32 %v528_v35 }
 0x27b   : > { %v940_v36 = vpop.eup %939 }
 0x27c   : > { %v530_v37 = vsel %vm523_vm3, %v940_v36, 0.0 }
 0x27d   : > { %531 = vadd.xlane.f32.xlu0 %v530_v37 }
 0x30a   : > { %v532_v38 = vpop.xlane.xlu0 %531 }
 0x30b   : > { %941 = vrcp.f32 %v532_v38 }
 0x315   : > { %v942_v39 = vpop.eup %941 }
 0x316   : > { %v534_v40 = vmul.f32 %v942_v39, %v940_v36 }
 0x318   : > { %865 = vmatmul.mubr.msk.f32.vlgmr.msra.gmra.mrb[4].mxu0 %vm523_vm3, %v534_v40  ;;  %642 = vst.msk [vmem:[%s1209_s8] sm:$0xff] %vm523_vm3, %v534_v40 }
 0x3eb   : > { %v608_v41 = vpop.f32.mrb[4].mxu0 }
 0x3ec   : > { %v866_v42 = vpop.f32.mrb[5].mxu0  ;;  %v612_v43 = vsel %vm254_vm0, %v608_v41, 0.0 }
 0x3ed   : > { %613 = vadd.xlane.f32.xlu1 %v612_v43 }
 0x47a   : > { %v614_v44 = vpop.xlane.xlu1 %613 }
 0x47b   : > { %v616_v45 = vmul.f32 0.03125, %v614_v44 }
 0x47d   : > { %v617_v46 = vsub.f32 %v608_v41, %v616_v45 }
 0x47f   : > { %v618_v47 = vmul.f32 %v617_v46, %v617_v46 }
 0x481   : > { %v619_v48 = vsel %vm254_vm0, %v618_v47, 0.0 }
 0x482   : > { %620 = vadd.xlane.f32.xlu0 %v619_v48 }
 0x50f   : > { %v621_v49 = vpop.xlane.xlu0 %620 }
 0x510   : > { %v622_v50 = vmul.f32 0.03125, %v621_v49 }
 0x512   : > { %v623_v51 = vadd.f32 1e-05, %v622_v50 }
 0x514   : > { %943 = vrsqrt.f32 %v623_v51 }
 0x51e   : > { %v944_v52 = vpop.eup %943 }
 0x51f   : > { %v625_v53 = vmul.f32 %v944_v52, %v617_v46 }
 0x521   : > { %v626_v54 = vmax.f32 %v625_v53, 0.0 }
 0x523   : > { %v627_v55 = vadd.f32 %v626_v54, %v1178_v18 }
 0x525   : > { %v628_v56 = vsel %vm254_vm0, %v627_v55, 0.0 }
 0x526   : > { %629 = vadd.xlane.f32.xlu0 %v628_v56 }
 0x5b3   : > { %v630_v57 = vpop.xlane.xlu0 %629 }
 0x5b4   : > { %v631_v58 = vmul.f32 0.03125, %v630_v57 }
 0x5b6   : > { %v632_v59 = vsub.f32 %v627_v55, %v631_v58 }
 0x5b8   : > { %v633_v60 = vmul.f32 %v632_v59, %v632_v59 }
 0x5ba   : > { %v634_v61 = vsel %vm254_vm0, %v633_v60, 0.0 }
 0x5bb   : > { %635 = vadd.xlane.f32.xlu0 %v634_v61 }
 0x5bc   : > { %960 = shalt.err (!%p957_p3)
}
 0x5bd   : > { %s961_s25 = scalar_lea.hbm %s1224_s12, 128  ;;  %s965_s8 = scalar_lea.hbm %s1301_s5, 256 }
 0x5be   : > { %p962_p4 = scmp.ne.s32.totalorder %s1224_s12, %s961_s25  ;;  %p966_p9 = scmp.lt.u32.totalorder %s1224_s12, %s1301_s5 }
 0x5bf   : > { %p967_p10 = scmp.lt.u32.totalorder %s965_s8, %s961_s25  ;;  %p969_p12 = scmp.lt.u32.totalorder %s961_s25, %s1224_s12 }
 0x5c0   : > { %p963_p7 = pnand %p962_p4, %p1117_p5 }
 0x5c1   : > { %p968_p11 = por %p967_p10, %p966_p9 }
 0x5c2   : > { %p964_p8 = pneg %p963_p7 }
 0x5c3   : > { %p970_p13 = por %p969_p12, %p968_p11 }
 0x5c5   : > { %p971_p0 = pnand %p970_p13, %p964_p8 }
 0x5c7   : > { %974 = shalt.err (!%p971_p0)
}
 0x5c8   : > { %892 = dma.vmem_to_hbm [thread:$0]  (%p1117_p5), %s676_s13, 128, %s1224_s12, %s649_s14  }
 0x5c9   : > { %s232_s15 = scalar_lea.vmem [#allocation2], %s782_s7  ;;  %s1252_s25 = scalar_lea.hbm %s1300_s4, %s805_s9 }
 0x5ca   : > { %s662_s16 = sshll.u32 %s232_s15, 4  ;;  %s644_s12 = scalar_lea.sflag [#allocation3], %s1203_s6  ;;  %s1254_s16 = int_to_ptr.vmem [resolvable:$true] %s662_s16 }
 0x5cb   : > { %s975_s13 = scalar_lea.vmem %s1254_s16, 128  ;;  %s1048_s7 = smov [#allocation2]  }
 0x5cc   : > { %p976_p1 = scmp.ne.s32.totalorder %s1254_s16, %s975_s13  ;;  %s979_s22 = sshll.u32 %s1048_s7, 4  ;;  %s980_s22 = int_to_ptr.vmem [resolvable:$false] %s979_s22 }
 0x5cd   : > { %s981_s14 = scalar_lea.vmem %s980_s22, 256  ;;  %p982_p4 = scmp.lt.s32.totalorder %s1254_s16, %s980_s22 }
 0x5ce   : > { %p977_p2 = pnand %p976_p1, %p1117_p5  ;;  %p983_p7 = scmp.lt.s32.totalorder %s981_s14, %s975_s13 }
 0x5d0   : > { %p978_p3 = pneg %p977_p2  ;;  %p984_p8 = por %p983_p7, %p982_p4 }
 0x5d2   : > { %p985_p9 = pnand %p984_p8, %p978_p3 }
 0x648   : > { %v636_v62 = vpop.xlane.xlu0 %635 }
 0x649   : > { %v637_v63 = vmul.f32 0.03125, %v636_v62 }
 0x64b   : > { %v638_v0 = vadd.f32 1e-05, %v637_v63 }
 0x64d   : > { %945 = vrsqrt.f32 %v638_v0 }
 0x657   : > { %v946_v1 = vpop.eup %945 }
 0x658   : > { %v640_v2 = vmul.f32 %v946_v1, %v632_v59 }
 0x65a   : > { %641 = vst.msk [vmem:[%s232_s15] sm:$0xff] %vm254_vm0, %v640_v2 }
 0x65b   : > { %988 = shalt.err (!%p985_p9)
}
 0x65c   : > { %s989_s6 = scalar_lea.hbm %s1252_s25, 128  ;;  %s993_s30 = scalar_lea.hbm %s1300_s4, 256 }
 0x65d   : > { %p990_p10 = scmp.ne.s32.totalorder %s1252_s25, %s989_s6  ;;  %p994_p13 = scmp.lt.u32.totalorder %s1252_s25, %s1300_s4 }
 0x65e   : > { %p995_p0 = scmp.lt.u32.totalorder %s993_s30, %s989_s6  ;;  %p997_p2 = scmp.lt.u32.totalorder %s989_s6, %s1252_s25 }
 0x65f   : > { %p991_p11 = pnand %p990_p10, %p1117_p5 }
 0x660   : > { %p996_p1 = por %p995_p0, %p994_p13 }
 0x661   : > { %p992_p12 = pneg %p991_p11 }
 0x662   : > { %p998_p3 = por %p997_p2, %p996_p1 }
 0x664   : > { %p999_p4 = pnand %p998_p3, %p992_p12 }
 0x666   : > { %1002 = shalt.err (!%p999_p4)
}
 0x667   : > { %891 = dma.vmem_to_hbm [thread:$0]  (%p1117_p5), %s1254_s16, 128, %s1252_s25, %s644_s12  }
 0x668 PF: > { %p902_p7 = scmp.ge.s32.totalorder %s1041_s21, 2  ;;  %s687_s11 = sand.u32 1, %s1029_s18  }
 0x669   : > { %s688_s15 = scalar_lea.sflag [#allocation3], %s687_s11 }
 0x66a   : > { %p896_p8 = pnand %p902_p7, %p1121_p6 }
 0x66c   : > { %1020 = dma.done.wait (!%p896_p8), %s688_s15, 128  }
 0x66d   : > { %1022 = vsyncadd (!%p896_p8), %s688_s15, 4294967168  ;;  %s697_s17 = scalar_lea.sflag [#allocation5], %s687_s11 }
 0x66e   : > { %1024 = dma.done.wait (!%p896_p8), %s697_s17, 128  }
 0x66f   : > { %1026 = vsyncadd (!%p896_p8), %s697_s17, 4294967168  ;;  %p19_p5 = scmp.ge.s32.totalorder %s1104_s24, 4   ;;  %s1306_s18 = smov %s1033_s19 }
 0x670   : > { %s1307_s19 = smov %s1037_s20  ;;  %s1308_s20 = smov %s1115_s27 }
 0x671   : > { %s1309_s21 = smov %s1104_s24  ;;  %21 = sbr.rel (!%p19_p5) target bundleno = 5 (0x5), region = 91 }
 0x678   :  { %702 = vsyncpa [#allocation3], 1 }
 0x679   :  { %704 = vsyncpa [#allocation3 + $0x1], 1 }
 0x67a   :  { %705 = vsyncpa [#allocation5], 1 }
 0x67b   :  { %707 = vsyncpa [#allocation5 + $0x1], 1 }

</bundles_post_ra>
